<compile_context>
chip_gen: v6e
topology: v6e:2x2x1
jax: 0.10.0
libtpu: 0.0.40
codegen_flags: <defaults>
</compile_context>

<pallas_src>
import functools

import jax
import jax.numpy as jnp
from jax.experimental import pallas as pl
from jax.experimental.pallas import tpu as pltpu


def _reward_criterion_kernel(inp_ref, seq_ref, rew_ref, num_ref, den_ref,
                             *, b, block_b, ragged):
    """One B-tile: emit partial sum(input*reward*mask) and sum(mask)."""
    inp = inp_ref[...].astype(jnp.float32)              # [block_b, T]
    rew = rew_ref[...].astype(jnp.float32)               # [block_b, T]
    seq_pos = (seq_ref[...] > 0).astype(jnp.float32)     # [block_b, T]

    shape = seq_pos.shape
    col = jax.lax.broadcasted_iota(jnp.int32, shape, 1)
    # mask[:, 0] = 1 ; mask[:, t] = (seq[:, t-1] > 0) for t >= 1.
    # pltpu.roll is circular (XLU, effectively free); the wrapped column 0 is
    # overridden to 1.0, so the t-boundary wrap never leaks into the result.
    mask = jnp.where(col == 0, 1.0, pltpu.roll(seq_pos, shift=1, axis=1))

    prod = inp * rew
    if ragged:
        # Only the last tile can hang past B; zero both the mask and the
        # product there (jnp.where, not multiply, so OOB garbage/NaN cannot
        # poison the sums).
        rows_left = b - pl.program_id(0) * block_b
        row = jax.lax.broadcasted_iota(jnp.int32, shape, 0)
        rvalid = row < rows_left
        mask = jnp.where(rvalid, mask, 0.0)
        prod = jnp.where(rvalid, prod, 0.0)

    # Negation is folded into the wrapper-side finalize.
    num_ref[...] = jnp.sum(prod * mask, keepdims=True).reshape(1, 1, 1)
    den_ref[...] = jnp.sum(mask, keepdims=True).reshape(1, 1, 1)


def reward_criterion(inp, seq, reward, *, vmem_block_bytes=3 << 20):
    """Scalar SCST reward-criterion loss (matches the PyTorch forward)."""
    b, t = inp.shape
    assert seq.shape == (b, t) and reward.shape == (b, t)

    # Pick the B-tile so one block of all three inputs is ~vmem_block_bytes
    # (x2 for double buffering still leaves plenty of headroom on v7x).
    bytes_per_row = t * (jnp.dtype(inp.dtype).itemsize
                         + jnp.dtype(reward.dtype).itemsize
                         + jnp.dtype(seq.dtype).itemsize)
    max_rows = max(8, (vmem_block_bytes // max(bytes_per_row, 1)) // 8 * 8)
    if b <= max_rows:
        block_b, ragged = b, False          # block == full array dim is allowed
    else:
        block_b = max_rows                  # multiple of 8
        ragged = (b % block_b) != 0
    nblk = pl.cdiv(b, block_b)

    kernel = functools.partial(
        _reward_criterion_kernel, b=b, block_b=block_b, ragged=ragged)

    num_parts, den_parts = pl.pallas_call(
        kernel,
        out_shape=(
            jax.ShapeDtypeStruct((nblk, 1, 1), jnp.float32),
            jax.ShapeDtypeStruct((nblk, 1, 1), jnp.float32),
        ),
        grid=(nblk,),
        in_specs=[
            pl.BlockSpec((block_b, t), lambda i: (i, 0)),
            pl.BlockSpec((block_b, t), lambda i: (i, 0)),
            pl.BlockSpec((block_b, t), lambda i: (i, 0)),
        ],
        out_specs=(
            pl.BlockSpec((1, 1, 1), lambda i: (i, 0, 0)),
            pl.BlockSpec((1, 1, 1), lambda i: (i, 0, 0)),
        ),
        compiler_params=pltpu.CompilerParams(
            dimension_semantics=("parallel",)),
    )(inp, seq, reward)

    # Tiny finalize in the wrapper: reduce per-block partials, negate once.
    return -jnp.sum(num_parts) / jnp.sum(den_parts)


def _reference(logp, seq, reward):
    b = logp.shape[0]
    m = (seq > 0).astype(jnp.float32)
    m = jnp.concatenate([jnp.ones((b, 1), jnp.float32), m[:, :-1]], axis=1)
    return jnp.sum(-logp * reward * m) / jnp.sum(m)


if __name__ == "__main__":
    key = jax.random.PRNGKey(0)

    # --- small case (matches the module: batch=2, seq_len=8) ---------------
    k1, k2, k3 = jax.random.split(key, 3)
    B, T = 2, 8
    logp = -jnp.abs(jax.random.normal(k1, (B, T), jnp.float32))   # log-probs <= 0
    seq = jax.random.randint(k2, (B, T), 0, 6, dtype=jnp.int32)    # 0 = pad/end
    reward = jax.random.normal(k3, (B, T), jnp.float32)

    loss = jax.block_until_ready(reward_criterion(logp, seq, reward))
    ref = _reference(logp, seq, reward)
    assert jnp.allclose(loss, ref, rtol=1e-5, atol=1e-5), (float(loss), float(ref))

    # --- larger case forcing the tiled / ragged-last-tile path -------------
    k4, k5, k6 = jax.random.split(jax.random.PRNGKey(1), 3)
    B2, T2 = 20, 24
    logp2 = -jnp.abs(jax.random.normal(k4, (B2, T2), jnp.float32))
    seq2 = jax.random.randint(k5, (B2, T2), 0, 4, dtype=jnp.int32)
    reward2 = jax.random.normal(k6, (B2, T2), jnp.float32)

    # Tiny VMEM budget -> block_b=8, 3 grid steps, ragged last tile.
    loss2 = jax.block_until_ready(
        reward_criterion(logp2, seq2, reward2, vmem_block_bytes=2048))
    ref2 = _reference(logp2, seq2, reward2)
    assert jnp.allclose(loss2, ref2, rtol=1e-5, atol=1e-5), (float(loss2), float(ref2))

    print("KERNEL_OK")
</pallas_src>

<mosaic_0001>
module attributes {stable_mosaic.version = 11 : i64} {
  func.func @_reward_criterion_kernel(%arg0: i32, %arg1: memref<2x8xf32, #tpu.memory_space<vmem>>, %arg2: memref<2x8xi32, #tpu.memory_space<vmem>>, %arg3: memref<2x8xf32, #tpu.memory_space<vmem>>, %arg4: memref<1x1x1xf32, #tpu.memory_space<vmem>>, %arg5: memref<1x1x1xf32, #tpu.memory_space<vmem>>) attributes {dimension_semantics = [#tpu.dimension_semantics<parallel>], iteration_bounds = array<i64: 1>, scalar_prefetch = 0 : i64, scratch_operands = 0 : i64, tpu.core_type = #tpu.core_type<tc>, window_params = [{transform_indices = @transform_0, window_bounds = array<i64: 2, 8>}, {transform_indices = @transform_1, window_bounds = array<i64: 2, 8>}, {transform_indices = @transform_2, window_bounds = array<i64: 2, 8>}, {transform_indices = @transform_3, window_bounds = array<i64: 1, 1, 1>}, {transform_indices = @transform_4, window_bounds = array<i64: 1, 1, 1>}]} {
    %c0 = arith.constant 0 : index
    %c0_0 = arith.constant 0 : index
    %0 = vector.load %arg1[%c0, %c0_0] : memref<2x8xf32, #tpu.memory_space<vmem>>, vector<2x8xf32>
    %c0_1 = arith.constant 0 : index
    %c0_2 = arith.constant 0 : index
    %1 = vector.load %arg3[%c0_1, %c0_2] : memref<2x8xf32, #tpu.memory_space<vmem>>, vector<2x8xf32>
    %c0_3 = arith.constant 0 : index
    %c0_4 = arith.constant 0 : index
    %2 = vector.load %arg2[%c0_3, %c0_4] : memref<2x8xi32, #tpu.memory_space<vmem>>, vector<2x8xi32>
    %c0_i32 = arith.constant 0 : i32
    %3 = vector.broadcast %c0_i32 : i32 to vector<2x8xi32>
    %4 = arith.cmpi sgt, %2, %3 : vector<2x8xi32>
    %5 = arith.extui %4 : vector<2x8xi1> to vector<2x8xi32>
    %6 = arith.sitofp %5 : vector<2x8xi32> to vector<2x8xf32>
    %7 = tpu.iota {dimensions = array<i32: 1>} : vector<2x8xi32>
    %c0_i32_5 = arith.constant 0 : i32
    %8 = vector.broadcast %c0_i32_5 : i32 to vector<2x8xi32>
    %9 = arith.cmpi eq, %7, %8 : vector<2x8xi32>
    %c1_i32 = arith.constant 1 : i32
    %10 = tpu.dynamic_rotate %6 by %c1_i32 dim 1 : vector<2x8xf32>, i32 -> vector<2x8xf32>
    %cst = arith.constant 1.000000e+00 : f32
    %11 = vector.broadcast %cst : f32 to vector<2x8xf32>
    %12 = arith.select %9, %11, %10 : vector<2x8xi1>, vector<2x8xf32>
    %13 = arith.mulf %0, %1 : vector<2x8xf32>
    %14 = arith.mulf %13, %12 : vector<2x8xf32>
    %15 = vector.shape_cast %14 : vector<2x8xf32> to vector<1x2x8xf32>
    %cst_6 = arith.constant dense<0.000000e+00> : vector<1xf32>
    %16 = vector.multi_reduction <add>, %15, %cst_6 [1, 2] : vector<1x2x8xf32> to vector<1xf32>
    %17 = vector.shape_cast %16 : vector<1xf32> to vector<1x1x1xf32>
    %18 = vector.extract %17[0, 0, 0] : f32 from vector<1x1x1xf32>
    %19 = vector.broadcast %18 : f32 to vector<1x1xf32>
    %20 = vector.shape_cast %19 : vector<1x1xf32> to vector<1x1x1xf32>
    %c0_7 = arith.constant 0 : index
    %c0_8 = arith.constant 0 : index
    %c0_9 = arith.constant 0 : index
    %21 = vector.load %arg4[%c0_7, %c0_8, %c0_9] : memref<1x1x1xf32, #tpu.memory_space<vmem>>, vector<1x1x1xf32>
    tpu.vector_store %arg4[%c0_7, %c0_8, %c0_9], %20 {strides = array<i32>} : memref<1x1x1xf32, #tpu.memory_space<vmem>>, vector<1x1x1xf32>,
    %22 = vector.shape_cast %12 : vector<2x8xf32> to vector<1x2x8xf32>
    %cst_10 = arith.constant dense<0.000000e+00> : vector<1xf32>
    %23 = vector.multi_reduction <add>, %22, %cst_10 [1, 2] : vector<1x2x8xf32> to vector<1xf32>
    %24 = vector.shape_cast %23 : vector<1xf32> to vector<1x1x1xf32>
    %25 = vector.extract %24[0, 0, 0] : f32 from vector<1x1x1xf32>
    %26 = vector.broadcast %25 : f32 to vector<1x1xf32>
    %27 = vector.shape_cast %26 : vector<1x1xf32> to vector<1x1x1xf32>
    %c0_11 = arith.constant 0 : index
    %c0_12 = arith.constant 0 : index
    %c0_13 = arith.constant 0 : index
    %28 = vector.load %arg5[%c0_11, %c0_12, %c0_13] : memref<1x1x1xf32, #tpu.memory_space<vmem>>, vector<1x1x1xf32>
    tpu.vector_store %arg5[%c0_11, %c0_12, %c0_13], %27 {strides = array<i32>} : memref<1x1x1xf32, #tpu.memory_space<vmem>>, vector<1x1x1xf32>,
    return
  }
  func.func @transform_0(%arg0: i32) -> (i32, i32) {
    %c0_i32 = arith.constant 0 : i32
    %c0_i32_0 = arith.constant 0 : i32
    return %arg0, %c0_i32 : i32, i32
  }
  func.func @transform_1(%arg0: i32) -> (i32, i32) {
    %c0_i32 = arith.constant 0 : i32
    %c0_i32_0 = arith.constant 0 : i32
    return %arg0, %c0_i32 : i32, i32
  }
  func.func @transform_2(%arg0: i32) -> (i32, i32) {
    %c0_i32 = arith.constant 0 : i32
    %c0_i32_0 = arith.constant 0 : i32
    return %arg0, %c0_i32 : i32, i32
  }
  func.func @transform_3(%arg0: i32) -> (i32, i32, i32) {
    %c0_i32 = arith.constant 0 : i32
    %c0_i32_0 = arith.constant 0 : i32
    %c0_i32_1 = arith.constant 0 : i32
    return %arg0, %c0_i32, %c0_i32_0 : i32, i32, i32
  }
  func.func @transform_4(%arg0: i32) -> (i32, i32, i32) {
    %c0_i32 = arith.constant 0 : i32
    %c0_i32_0 = arith.constant 0 : i32
    %c0_i32_1 = arith.constant 0 : i32
    return %arg0, %c0_i32, %c0_i32_0 : i32, i32, i32
  }
}

</mosaic_0001>

<bundles_post_ra>
// kernel: tpu_custom_call.1
= control target key start
LH: loop header
LB: loop body
LE: loop exit
PB: predicated region body
PF: predicated region fallthrough
CT: control target
= control target key end

     0   :  { %10 = vsyncpa [#allocation3], 0  ;;  %s270_s0 = inlined_call_operand.hbm [shape: f32[2,8], index: 0, kind: input, shape index: {}]   ;;  %s271_s1 = inlined_call_operand.hbm [shape: s32[2,8], index: 1, kind: input, shape index: {}]   ;;  %s272_s2 = inlined_call_operand.vmem [shape: f32[2,8], index: 2, kind: input, shape index: {}]   ;;  %s273_s3 = inlined_call_operand.hbm [shape: f32[1,1,1], index: 3, kind: output, shape index: {0}]   ;;  %s274_s4 = inlined_call_operand.hbm [shape: f32[1,1,1], index: 4, kind: output, shape index: {1}]  }
   0x1   :  { %11 = vsyncpa [#allocation6], 0 }
   0x2   :  { %12 = vsyncpa [#allocation4], 0 }
   0x3   :  { %13 = vsyncpa [#allocation9], 0  ;;  %s221_s15 = smov [#allocation2]   ;;  %s222_s17 = smov [#allocation5]  }
   0x4   :  { %s20_s16 = sshll.u32 %s221_s15, 4  ;;  %s30_s18 = sshll.u32 %s222_s17, 4  ;;  %s21_s16 = int_to_ptr.vmem [resolvable:$true] %s20_s16  ;;  %s31_s18 = int_to_ptr.vmem [resolvable:$true] %s30_s18 }
   0x5   :  { %s141_s19 = scalar_lea.vmem %s21_s16, 32  ;;  %p146_p1 = scmp.lt.s32.totalorder %s21_s16, %s21_s16 }
   0x6   :  { %p142_p0 = scmp.ne.s32.totalorder %s21_s16, %s141_s19  ;;  %p147_p2 = scmp.lt.s32.totalorder %s141_s19, %s141_s19 }
   0x8   :  { %p148_p3 = por %p147_p2, %p146_p1 }
   0xa   :  { %p149_p4 = pnand %p148_p3, %p142_p0 }
   0xc   :  { %152 = shalt.err (!%p149_p4)
}
   0xd   :  { %23 = dma.hbm_to_vmem [thread:$0]  %s270_s0, 32, %s21_s16, [#allocation3]  }
   0xe   :  { %s161_s22 = scalar_lea.vmem %s31_s18, 32  ;;  %p166_p6 = scmp.lt.s32.totalorder %s31_s18, %s31_s18 }
   0xf   :  { %p162_p5 = scmp.ne.s32.totalorder %s31_s18, %s161_s22  ;;  %p167_p7 = scmp.lt.s32.totalorder %s161_s22, %s161_s22 }
  0x11   :  { %p168_p8 = por %p167_p7, %p166_p6 }
  0x13   :  { %p169_p9 = pnand %p168_p8, %p162_p5 }
  0x15   :  { %172 = shalt.err (!%p169_p9)
}
  0x16   :  { %33 = dma.hbm_to_vmem [thread:$0]  %s271_s1, 32, %s31_s18, [#allocation6]  }
  0x17   :  { %213 = dma.done.wait [#allocation3], 32  }
  0x18   :  { %214 = vsyncadd [#allocation3], 4294967264 }
  0x19   :  { %215 = dma.done.wait [#allocation6], 32  }
  0x1a   :  { %216 = vsyncadd [#allocation6], 4294967264  ;;  %v44_v0 = vld [vmem:[#allocation5] sm:$0x3]  ;;  %v223_v1 = vmov 0.0   ;;  %s224_s0 = smov 8   ;;  %v48_v7 = vlaneseq }
  0x1b   :  { %vm45_vm0 = vcmp.gt.s32.totalorder %v44_v0, 0  ;;  %vm51_vm1 = vcmask 1047616   ;;  %s225_s25 = smov 121   ;;  %v42_v9 = vld [vmem:[#allocation2] sm:$0x3]  ;;  %vm65_vm3 = vcmask 58368  }
  0x1c   :  { %v121_v2 = vsel %vm45_vm0, 1.0, %v223_v1  ;;  %v49_v8 = vand.u32 127, %v48_v7  ;;  %v43_v10 = vld [vmem:[%s272_s2] sm:$0x3]  ;;  %s226_s2 = smov [#allocation7]   ;;  %s227_s28 = smov [#allocation8]  }
  0x1d   :  { %52 = vrot.lane.b32.xlu0 %v121_v2, %s224_s0  ;;  %v63_v11 = vmul.f32 %v43_v10, %v42_v9  ;;  %s97_s27 = sshll.u32 %s226_s2, 4  ;;  %s107_s29 = sshll.u32 %s227_s28, 4  ;;  %vm77_vm4 = vcmask 0   ;;  %s98_s27 = int_to_ptr.vmem [resolvable:$true] %s97_s27  ;;  %s108_s29 = int_to_ptr.vmem [resolvable:$true] %s107_s29 }
  0x1e   :  { %vm50_vm2 = vcmp.eq.s32.totalorder %v49_v8, 0  ;;  %s173_s6 = scalar_lea.vmem %s98_s27, 16  ;;  %s177_s7 = scalar_lea.vmem %s98_s27, 32 }
  0x1f   :  { %p174_p10 = scmp.ne.s32.totalorder %s98_s27, %s173_s6  ;;  %p178_p11 = scmp.lt.s32.totalorder %s98_s27, %s98_s27 }
  0x20   :  { %p179_p12 = scmp.lt.s32.totalorder %s177_s7, %s173_s6 }
  0x22   :  { %p180_p13 = por %p179_p12, %p178_p11 }
  0x24   :  { %p181_p0 = pnand %p180_p13, %p174_p10 }
  0x8f   :  { %v53_v3 = vpop.permute.xlu0 %52 }
  0x90   :  { %v54_v4 = vsel %vm51_vm1, %v53_v3, %v121_v2 }
  0x91   :  { %55 = vrot.lane.b32.xlu0 %v54_v4, %s224_s0 }
 0x103   :  { %v56_v5 = vpop.permute.xlu0 %55 }
 0x104   :  { %v57_v6 = vsel %vm51_vm1, %v56_v5, %v121_v2 }
 0x105   :  { %59 = vrot.lane.b32.xlu1 %v57_v6, %s225_s25 }
 0x177   :  { %v60_v12 = vpop.permute.xlu1 %59 }
 0x178   :  { %v62_v13 = vsel %vm50_vm2, 1.0, %v60_v12 }
 0x179   :  { %v64_v14 = vmul.f32 %v63_v11, %v62_v13  ;;  %v79_v15 = vsel %vm65_vm3, %v62_v13, 0.0 }
 0x17a   :  { %80 = vadd.xlane.f32.xlu0 %v79_v15 }
 0x17b   :  { %v66_v16 = vsel %vm65_vm3, %v64_v14, 0.0 }
 0x17c   :  { %67 = vadd.xlane.f32.xlu1 %v66_v16 }
 0x203   :  { %v81_v17 = vpop.xlane.xlu0 %80 }
 0x204   :  { %v82_v18 = vrot.slane %v81_v17, 4 }
 0x205   :  { %v68_v19 = vpop.xlane.xlu1 %67 }
 0x206   :  { %v83_v20 = vadd.f32 %v82_v18, %v81_v17  ;;  %v69_v21 = vrot.slane %v68_v19, 4 }
 0x208   :  { %v84_v22 = vrot.slane %v83_v20, 2  ;;  %v70_v23 = vadd.f32 %v69_v21, %v68_v19 }
 0x20a   :  { %v85_v24 = vadd.f32 %v84_v22, %v83_v20  ;;  %v71_v25 = vrot.slane %v70_v23, 2 }
 0x20c   :  { %v72_v26 = vadd.f32 %v71_v25, %v70_v23  ;;  %v86_v27 = vrot.slane %v85_v24, 1 }
 0x20e   :  { %v73_v28 = vrot.slane %v72_v26, 1  ;;  %v87_v30 = vadd.f32 %v86_v27, %v85_v24 }
 0x210   :  { %v74_v29 = vadd.f32 %v73_v28, %v72_v26 }
 0x212   :  { %122 = vpush %v74_v29 }
 0x213   :  { %124 = vpush %v87_v30 }
 0x243   :  { %s123_s30 = spop %122 }
 0x244   :  { %v76_v31 = vstv %s123_s30  ;;  %s125_s5 = spop %124 }
 0x245   :  { %v89_v32 = vstv %s125_s5  ;;  %78 = vst.msk [vmem:[#allocation7] sm:$0x1] %vm77_vm4, %v76_v31 }
 0x246   :  { %184 = shalt.err (!%p181_p0)
}
 0x247   :  { %100 = dma.vmem_to_hbm [thread:$0]  %s98_s27, 16, %s273_s3, [#allocation4]   ;;  %90 = vst.msk [vmem:[#allocation8] sm:$0x1] %vm77_vm4, %v89_v32 }
 0x248   :  { %s193_s10 = scalar_lea.vmem %s108_s29, 16  ;;  %s197_s11 = scalar_lea.vmem %s108_s29, 32 }
 0x249   :  { %p194_p1 = scmp.ne.s32.totalorder %s108_s29, %s193_s10  ;;  %p198_p2 = scmp.lt.s32.totalorder %s108_s29, %s108_s29 }
 0x24a   :  { %p199_p3 = scmp.lt.s32.totalorder %s197_s11, %s193_s10 }
 0x24c   :  { %p200_p4 = por %p199_p3, %p198_p2 }
 0x24e   :  { %p201_p5 = pnand %p200_p4, %p194_p1 }
 0x250   :  { %204 = shalt.err (!%p201_p5)
}
 0x251   :  { %110 = dma.vmem_to_hbm [thread:$0]  %s108_s29, 16, %s274_s4, [#allocation9]  }
 0x252   :  { %217 = dma.done.wait [#allocation4], 16  }
 0x253   :  { %218 = vsyncadd [#allocation4], 4294967280 }
 0x254   :  { %219 = dma.done.wait [#allocation9], 16  }
 0x255   :  { %220 = vsyncadd [#allocation9], 4294967280 }
 0x256   :  { %117 = vsyncpa [#allocation3], 1 }
 0x257   :  { %118 = vsyncpa [#allocation6], 1 }
 0x258   :  { %119 = vsyncpa [#allocation4], 1 }
 0x259   :  { %120 = vsyncpa [#allocation9], 1 }

</bundles_post_ra>
